<compile_context>
chip_gen: v5e
topology: v5e:2x2
jax: 0.10.0
libtpu: 0.0.40
codegen_flags: <defaults>
</compile_context>

<pallas_src>
import jax
import jax.numpy as jnp
from jax.experimental import pallas as pl
from jax.experimental.pallas import tpu as pltpu


def _round_up(x, m):
    return ((x + m - 1) // m) * m


def _resident_spec(block_shape, index_map):
    """BlockSpec for a grid-invariant operand: single-buffer it if supported."""
    try:
        return pl.BlockSpec(block_shape, index_map, pipeline_mode=pl.Buffered(1))
    except (TypeError, AttributeError):
        return pl.BlockSpec(block_shape, index_map)


def _batch_tile(B, compute_dtype):
    """Sublane-packed batch tile (16 for bf16, 8 for f32) with a v7x-safe cap."""
    is_bf16 = jnp.dtype(compute_dtype) == jnp.dtype(jnp.bfloat16)
    mult = 16 if is_bf16 else 8
    cap = 512 if is_bf16 else 256
    bm = min(_round_up(B, mult), cap)
    return bm, _round_up(B, bm)


def _vmem_limit(bm, Ip, Hp, Op, cd_bytes, h_bytes, y_bytes, extra=0):
    """Weights single-buffered + double-buffered activation/output blocks."""
    weights = (Ip * Hp + Hp * Hp + Hp * Op) * cd_bytes + (Hp + Op) * 4
    acts = 2 * (bm * Ip + bm * Hp) * cd_bytes
    outs = 2 * (bm * Hp * h_bytes + bm * Op * y_bytes)
    total = weights + acts + outs + extra
    return int(min(100 * 2**20, max(int(total * 1.5), 16 * 2**20)))


# ---------------------------------------------------------------------------
# Kernels
# ---------------------------------------------------------------------------
def rnn_cell_kernel(x_ref, h_ref, wxh_ref, whh_ref, bh_ref, why_ref, by_ref,
                    h_out_ref, y_out_ref):
    # Two MXU pushes into one f32 accumulator (no wrapper-side concat needed).
    pre = jnp.dot(x_ref[...], wxh_ref[...], preferred_element_type=jnp.float32)
    pre = pre + jnp.dot(h_ref[...], whh_ref[...],
                        preferred_element_type=jnp.float32)
    h_t = jnp.tanh(pre + bh_ref[...])                     # f32 on EUP

    y_t = jnp.dot(h_t.astype(why_ref.dtype), why_ref[...],
                  preferred_element_type=jnp.float32) + by_ref[...]

    h_out_ref[...] = h_t.astype(h_out_ref.dtype)
    y_out_ref[...] = y_t.astype(y_out_ref.dtype)


def rnn_seq_kernel(x_ref, h0_ref, wxh_ref, whh_ref, bh_ref, why_ref, by_ref,
                   y_ref, h_out_ref, h_carry):
    """Grid = (batch_tiles, T).  Weights stay VMEM-resident across all t;
    the recurrent state is carried in an f32 VMEM scratch (never rounded)."""
    t = pl.program_id(1)

    @pl.when(t == 0)
    def _():
        h_carry[...] = h0_ref[...]                        # f32 init per batch tile

    x_t = x_ref[0]                                        # (bm, Ip), compute dtype
    pre = jnp.dot(x_t, wxh_ref[...], preferred_element_type=jnp.float32)
    pre = pre + jnp.dot(h_carry[...].astype(whh_ref.dtype), whh_ref[...],
                        preferred_element_type=jnp.float32)
    h_t = jnp.tanh(pre + bh_ref[...])                     # f32
    y_t = jnp.dot(h_t.astype(why_ref.dtype), why_ref[...],
                  preferred_element_type=jnp.float32) + by_ref[...]

    h_carry[...] = h_t                                    # f32 carry, no rounding
    y_ref[0] = y_t.astype(y_ref.dtype)
    h_out_ref[...] = h_t.astype(h_out_ref.dtype)          # final step's value persists


# ---------------------------------------------------------------------------
# One-time parameter preparation (hoisted out of any time loop)
# ---------------------------------------------------------------------------
def prepare_params(params, compute_dtype=jnp.bfloat16):
    """Transpose + zero-pad PyTorch-convention weights to lane-aligned layout.

    MXU operands default to bf16 (f32 accumulation / bias / tanh stay f32);
    pass compute_dtype=jnp.float32 for bit-strict results.

    params: xh_w [H, I], xh_b [H], hh_w [H, H], hh_b [H], hy_w [O, H], hy_b [O]
    """
    H, I = params["xh_w"].shape
    O = params["hy_w"].shape[0]
    Ip, Hp, Op = _round_up(I, 128), _round_up(H, 128), _round_up(O, 128)

    wxh = jnp.zeros((Ip, Hp), compute_dtype).at[:I, :H].set(
        params["xh_w"].T.astype(compute_dtype))
    whh = jnp.zeros((Hp, Hp), compute_dtype).at[:H, :H].set(
        params["hh_w"].T.astype(compute_dtype))
    bh = jnp.zeros((1, Hp), jnp.float32).at[0, :H].set(
        (params["xh_b"] + params["hh_b"]).astype(jnp.float32))
    why = jnp.zeros((Hp, Op), compute_dtype).at[:H, :O].set(
        params["hy_w"].T.astype(compute_dtype))
    by = jnp.zeros((1, Op), jnp.float32).at[0, :O].set(
        params["hy_b"].astype(jnp.float32))

    return {"wxh": wxh, "whh": whh, "bh": bh, "why": why, "by": by,
            "dims": (I, H, O), "compute_dtype": compute_dtype}


# ---------------------------------------------------------------------------
# Single time step (the PyTorch module's forward)
# ---------------------------------------------------------------------------
def rnn_cell_forward(x_t, h_prev, kparams, *, h_dtype=jnp.float32):
    """x_t: [B, I], h_prev: [B, H] -> (h_t [B, H], y_t [B, O])."""
    I, H, O = kparams["dims"]
    cd = kparams["compute_dtype"]
    Ip, Hp = kparams["wxh"].shape
    Op = kparams["why"].shape[1]
    B = x_t.shape[0]
    bm, Bp = _batch_tile(B, cd)

    x_pad = jnp.zeros((Bp, Ip), cd).at[:B, :I].set(x_t.astype(cd))
    h_pad = jnp.zeros((Bp, Hp), cd).at[:B, :H].set(h_prev.astype(cd))

    y_dtype = x_t.dtype
    cd_b = jnp.dtype(cd).itemsize
    vmem = _vmem_limit(bm, Ip, Hp, Op, cd_b,
                       jnp.dtype(h_dtype).itemsize, jnp.dtype(y_dtype).itemsize)
    weight_bytes = (Ip * Hp + Hp * Hp + Hp * Op) * cd_b + (Hp + Op) * 4
    cost = pl.CostEstimate(
        flops=2 * Bp * (Ip * Hp + Hp * Hp + Hp * Op),
        transcendentals=Bp * Hp,
        bytes_accessed=weight_bytes + (Bp * Ip + Bp * Hp) * cd_b
        + Bp * Hp * jnp.dtype(h_dtype).itemsize
        + Bp * Op * jnp.dtype(y_dtype).itemsize)

    h_out, y_out = pl.pallas_call(
        rnn_cell_kernel,
        out_shape=(jax.ShapeDtypeStruct((Bp, Hp), h_dtype),
                   jax.ShapeDtypeStruct((Bp, Op), y_dtype)),
        grid=(Bp // bm,),
        in_specs=[
            pl.BlockSpec((bm, Ip), lambda i: (i, 0)),       # x: batch-tiled
            pl.BlockSpec((bm, Hp), lambda i: (i, 0)),       # h: batch-tiled
            _resident_spec((Ip, Hp), lambda i: (0, 0)),     # W_xh^T (resident)
            _resident_spec((Hp, Hp), lambda i: (0, 0)),     # W_hh^T (resident)
            _resident_spec((1, Hp), lambda i: (0, 0)),      # b_xh + b_hh
            _resident_spec((Hp, Op), lambda i: (0, 0)),     # W_hy^T (resident)
            _resident_spec((1, Op), lambda i: (0, 0)),      # b_hy
        ],
        out_specs=(pl.BlockSpec((bm, Hp), lambda i: (i, 0)),
                   pl.BlockSpec((bm, Op), lambda i: (i, 0))),
        compiler_params=pltpu.CompilerParams(
            dimension_semantics=("parallel",),              # shards batch on v7x
            vmem_limit_bytes=vmem),
        cost_estimate=cost,
    )(x_pad, h_pad, kparams["wxh"], kparams["whh"], kparams["bh"],
      kparams["why"], kparams["by"])

    return h_out[:B, :H], y_out[:B, :O]


# ---------------------------------------------------------------------------
# Full sequence (time loop inside the kernel; weights resident across steps)
# ---------------------------------------------------------------------------
def rnn_sequence_forward(x_seq, h0, kparams, *, y_dtype=None):
    """x_seq: [T, B, I] (time-major), h0: [B, H] -> (y_seq [T, B, O], h_T [B, H])."""
    I, H, O = kparams["dims"]
    cd = kparams["compute_dtype"]
    Ip, Hp = kparams["wxh"].shape
    Op = kparams["why"].shape[1]
    T, B = x_seq.shape[0], x_seq.shape[1]
    bm, Bp = _batch_tile(B, cd)
    y_dtype = x_seq.dtype if y_dtype is None else y_dtype

    x_pad = jnp.zeros((T, Bp, Ip), cd).at[:, :B, :I].set(x_seq.astype(cd))
    h0_pad = jnp.zeros((Bp, Hp), jnp.float32).at[:B, :H].set(
        h0.astype(jnp.float32))

    cd_b = jnp.dtype(cd).itemsize
    weight_bytes = (Ip * Hp + Hp * Hp + Hp * Op) * cd_b + (Hp + Op) * 4
    vmem = _vmem_limit(bm, Ip, Hp, Op, cd_b, 4, jnp.dtype(y_dtype).itemsize,
                       extra=bm * Hp * 4)                   # + f32 h-carry scratch
    cost = pl.CostEstimate(
        flops=2 * T * Bp * (Ip * Hp + Hp * Hp + Hp * Op),
        transcendentals=T * Bp * Hp,
        bytes_accessed=weight_bytes + T * Bp * Ip * cd_b + Bp * Hp * 4
        + T * Bp * Op * jnp.dtype(y_dtype).itemsize + Bp * Hp * 4)

    y_pad, hT_pad = pl.pallas_call(
        rnn_seq_kernel,
        out_shape=(jax.ShapeDtypeStruct((T, Bp, Op), y_dtype),
                   jax.ShapeDtypeStruct((Bp, Hp), jnp.float32)),
        grid=(Bp // bm, T),                                 # time innermost
        in_specs=[
            pl.BlockSpec((1, bm, Ip), lambda b, t: (t, b, 0)),   # x_t slab
            pl.BlockSpec((bm, Hp), lambda b, t: (b, 0)),         # h0 (per tile)
            _resident_spec((Ip, Hp), lambda b, t: (0, 0)),       # weights stay
            _resident_spec((Hp, Hp), lambda b, t: (0, 0)),       # VMEM-resident
            _resident_spec((1, Hp), lambda b, t: (0, 0)),        # across all t
            _resident_spec((Hp, Op), lambda b, t: (0, 0)),
            _resident_spec((1, Op), lambda b, t: (0, 0)),
        ],
        out_specs=(pl.BlockSpec((1, bm, Op), lambda b, t: (t, b, 0)),
                   pl.BlockSpec((bm, Hp), lambda b, t: (b, 0))),
        scratch_shapes=[pltpu.VMEM((bm, Hp), jnp.float32)],  # f32 hidden carry
        compiler_params=pltpu.CompilerParams(
            dimension_semantics=("parallel", "arbitrary"),
            vmem_limit_bytes=vmem),
        cost_estimate=cost,
    )(x_pad, h0_pad, kparams["wxh"], kparams["whh"], kparams["bh"],
      kparams["why"], kparams["by"])

    return y_pad[:, :B, :O], hT_pad[:B, :H]


# ---------------------------------------------------------------------------
def init_params(key, input_size, hidden_size, output_size):
    """Matches RNNCell.init_weights(): N(0, 0.01) weights, zero biases."""
    k1, k2, k3 = jax.random.split(key, 3)
    std = 0.01
    return {
        "xh_w": std * jax.random.normal(k1, (hidden_size, input_size), jnp.float32),
        "xh_b": jnp.zeros((hidden_size,), jnp.float32),
        "hh_w": std * jax.random.normal(k2, (hidden_size, hidden_size), jnp.float32),
        "hh_b": jnp.zeros((hidden_size,), jnp.float32),
        "hy_w": std * jax.random.normal(k3, (output_size, hidden_size), jnp.float32),
        "hy_b": jnp.zeros((output_size,), jnp.float32),
    }


if __name__ == "__main__":
    B, I, H, O, T = 2, 16, 32, 8, 4
    key = jax.random.PRNGKey(0)
    kx, ks, kp = jax.random.split(key, 3)

    x_t = jax.random.normal(kx, (B, I), jnp.float32)
    x_seq = jax.random.normal(ks, (T, B, I), jnp.float32)
    h_prev = jnp.zeros((B, H), jnp.float32)          # init_hidden(batch_size=B)
    params = init_params(kp, I, H, O)

    # Plain-JAX reference (same math as the PyTorch forward).
    def step_ref(h, x):
        h_new = jnp.tanh(x @ params["xh_w"].T + params["xh_b"]
                         + h @ params["hh_w"].T + params["hh_b"])
        return h_new, h_new @ params["hy_w"].T + params["hy_b"]

    h_ref, y_ref = step_ref(h_prev, x_t)

    # --- f32 MXU operands: strict check -------------------------------------
    kparams_f32 = prepare_params(params, compute_dtype=jnp.float32)
    h_t, y_t = rnn_cell_forward(x_t, h_prev, kparams_f32)
    jax.block_until_ready((h_t, y_t))
    assert h_t.shape == (B, H) and y_t.shape == (B, O)
    assert jnp.allclose(h_t, h_ref, atol=1e-5), "h_t mismatch (f32)"
    assert jnp.allclose(y_t, y_ref, atol=1e-5), "y_t mismatch (f32)"

    # --- default bf16 MXU operands (f32 accumulation/tanh): loose check -----
    kparams_bf16 = prepare_params(params)            # compute_dtype=bf16 default
    h_b, y_b = rnn_cell_forward(x_t, h_prev, kparams_bf16)
    jax.block_until_ready((h_b, y_b))
    assert jnp.allclose(h_b, h_ref, atol=2e-2), "h_t mismatch (bf16)"
    assert jnp.allclose(y_b, y_ref, atol=2e-2), "y_t mismatch (bf16)"

    # --- full sequence: weights VMEM-resident across all T steps ------------
    y_seq, h_T = rnn_sequence_forward(x_seq, h_prev, kparams_f32)
    jax.block_until_ready((y_seq, h_T))
    h_T_ref, y_seq_ref = jax.lax.scan(step_ref, h_prev, x_seq)
    assert y_seq.shape == (T, B, O) and h_T.shape == (B, H)
    assert jnp.allclose(y_seq, y_seq_ref, atol=1e-4), "y_seq mismatch"
    assert jnp.allclose(h_T, h_T_ref, atol=1e-4), "h_T mismatch"

    print("KERNEL_OK")
</pallas_src>

<mosaic_0001>
module attributes {stable_mosaic.version = 11 : i64} {
  func.func @rnn_cell_kernel(%arg0: i32, %arg1: memref<8x128xf32, #tpu.memory_space<vmem>>, %arg2: memref<8x128xf32, #tpu.memory_space<vmem>>, %arg3: memref<128x128xf32, #tpu.memory_space<vmem>>, %arg4: memref<128x128xf32, #tpu.memory_space<vmem>>, %arg5: memref<1x128xf32, #tpu.memory_space<vmem>>, %arg6: memref<128x128xf32, #tpu.memory_space<vmem>>, %arg7: memref<1x128xf32, #tpu.memory_space<vmem>>, %arg8: memref<8x128xf32, #tpu.memory_space<vmem>>, %arg9: memref<8x128xf32, #tpu.memory_space<vmem>>) attributes {dimension_semantics = [#tpu.dimension_semantics<parallel>], iteration_bounds = array<i64: 1>, scalar_prefetch = 0 : i64, scratch_operands = 0 : i64, tpu.core_type = #tpu.core_type<tc>, window_params = [{transform_indices = @transform_0, window_bounds = array<i64: 8, 128>}, {transform_indices = @transform_1, window_bounds = array<i64: 8, 128>}, {pipeline_mode = #tpu.pipeline_mode<synchronous>, transform_indices = @transform_2, window_bounds = array<i64: 128, 128>}, {pipeline_mode = #tpu.pipeline_mode<synchronous>, transform_indices = @transform_3, window_bounds = array<i64: 128, 128>}, {pipeline_mode = #tpu.pipeline_mode<synchronous>, transform_indices = @transform_4, window_bounds = array<i64: 1, 128>}, {pipeline_mode = #tpu.pipeline_mode<synchronous>, transform_indices = @transform_5, window_bounds = array<i64: 128, 128>}, {pipeline_mode = #tpu.pipeline_mode<synchronous>, transform_indices = @transform_6, window_bounds = array<i64: 1, 128>}, {transform_indices = @transform_7, window_bounds = array<i64: 8, 128>}, {transform_indices = @transform_8, window_bounds = array<i64: 8, 128>}]} {
    %c0 = arith.constant 0 : index
    %c0_0 = arith.constant 0 : index
    %0 = vector.load %arg1[%c0, %c0_0] : memref<8x128xf32, #tpu.memory_space<vmem>>, vector<8x128xf32>
    %c0_1 = arith.constant 0 : index
    %c0_2 = arith.constant 0 : index
    %1 = vector.load %arg3[%c0_1, %c0_2] : memref<128x128xf32, #tpu.memory_space<vmem>>, vector<128x128xf32>
    %cst = arith.constant dense<0.000000e+00> : vector<8x128xf32>
    %2 = tpu.matmul %0, %1, %cst {dimension_numbers = #tpu.dot_dimension_numbers<[1], [0], [0], [1], [0, 0, 1, 1], [], []>} : vector<8x128xf32>, vector<128x128xf32>, vector<8x128xf32> -> vector<8x128xf32>
    %c0_3 = arith.constant 0 : index
    %c0_4 = arith.constant 0 : index
    %3 = vector.load %arg2[%c0_3, %c0_4] : memref<8x128xf32, #tpu.memory_space<vmem>>, vector<8x128xf32>
    %c0_5 = arith.constant 0 : index
    %c0_6 = arith.constant 0 : index
    %4 = vector.load %arg4[%c0_5, %c0_6] : memref<128x128xf32, #tpu.memory_space<vmem>>, vector<128x128xf32>
    %cst_7 = arith.constant dense<0.000000e+00> : vector<8x128xf32>
    %5 = tpu.matmul %3, %4, %cst_7 {dimension_numbers = #tpu.dot_dimension_numbers<[1], [0], [0], [1], [0, 0, 1, 1], [], []>} : vector<8x128xf32>, vector<128x128xf32>, vector<8x128xf32> -> vector<8x128xf32>
    %6 = arith.addf %2, %5 : vector<8x128xf32>
    %c0_8 = arith.constant 0 : index
    %c0_9 = arith.constant 0 : index
    %7 = vector.load %arg5[%c0_8, %c0_9] : memref<1x128xf32, #tpu.memory_space<vmem>>, vector<1x128xf32>
    %8 = vector.broadcast %7 : vector<1x128xf32> to vector<8x128xf32>
    %9 = arith.addf %6, %8 : vector<8x128xf32>
    %10 = math.tanh %9 : vector<8x128xf32>
    %c0_10 = arith.constant 0 : index
    %c0_11 = arith.constant 0 : index
    %11 = vector.load %arg6[%c0_10, %c0_11] : memref<128x128xf32, #tpu.memory_space<vmem>>, vector<128x128xf32>
    %cst_12 = arith.constant dense<0.000000e+00> : vector<8x128xf32>
    %12 = tpu.matmul %10, %11, %cst_12 {dimension_numbers = #tpu.dot_dimension_numbers<[1], [0], [0], [1], [0, 0, 1, 1], [], []>} : vector<8x128xf32>, vector<128x128xf32>, vector<8x128xf32> -> vector<8x128xf32>
    %c0_13 = arith.constant 0 : index
    %c0_14 = arith.constant 0 : index
    %13 = vector.load %arg7[%c0_13, %c0_14] : memref<1x128xf32, #tpu.memory_space<vmem>>, vector<1x128xf32>
    %14 = vector.broadcast %13 : vector<1x128xf32> to vector<8x128xf32>
    %15 = arith.addf %12, %14 : vector<8x128xf32>
    %c0_15 = arith.constant 0 : index
    %c0_16 = arith.constant 0 : index
    %16 = vector.load %arg8[%c0_15, %c0_16] : memref<8x128xf32, #tpu.memory_space<vmem>>, vector<8x128xf32>
    tpu.vector_store %arg8[%c0_15, %c0_16], %10 {strides = array<i32>} : memref<8x128xf32, #tpu.memory_space<vmem>>, vector<8x128xf32>,
    %c0_17 = arith.constant 0 : index
    %c0_18 = arith.constant 0 : index
    %17 = vector.load %arg9[%c0_17, %c0_18] : memref<8x128xf32, #tpu.memory_space<vmem>>, vector<8x128xf32>
    tpu.vector_store %arg9[%c0_17, %c0_18], %15 {strides = array<i32>} : memref<8x128xf32, #tpu.memory_space<vmem>>, vector<8x128xf32>,
    return
  }
  func.func @transform_0(%arg0: i32) -> (i32, i32) {
    %c0_i32 = arith.constant 0 : i32
    %c0_i32_0 = arith.constant 0 : i32
    return %arg0, %c0_i32 : i32, i32
  }
  func.func @transform_1(%arg0: i32) -> (i32, i32) {
    %c0_i32 = arith.constant 0 : i32
    %c0_i32_0 = arith.constant 0 : i32
    return %arg0, %c0_i32 : i32, i32
  }
  func.func @transform_2(%arg0: i32) -> (i32, i32) {
    %c0_i32 = arith.constant 0 : i32
    %c0_i32_0 = arith.constant 0 : i32
    %c0_i32_1 = arith.constant 0 : i32
    return %c0_i32, %c0_i32_0 : i32, i32
  }
  func.func @transform_3(%arg0: i32) -> (i32, i32) {
    %c0_i32 = arith.constant 0 : i32
    %c0_i32_0 = arith.constant 0 : i32
    %c0_i32_1 = arith.constant 0 : i32
    return %c0_i32, %c0_i32_0 : i32, i32
  }
  func.func @transform_4(%arg0: i32) -> (i32, i32) {
    %c0_i32 = arith.constant 0 : i32
    %c0_i32_0 = arith.constant 0 : i32
    %c0_i32_1 = arith.constant 0 : i32
    return %c0_i32, %c0_i32_0 : i32, i32
  }
  func.func @transform_5(%arg0: i32) -> (i32, i32) {
    %c0_i32 = arith.constant 0 : i32
    %c0_i32_0 = arith.constant 0 : i32
    %c0_i32_1 = arith.constant 0 : i32
    return %c0_i32, %c0_i32_0 : i32, i32
  }
  func.func @transform_6(%arg0: i32) -> (i32, i32) {
    %c0_i32 = arith.constant 0 : i32
    %c0_i32_0 = arith.constant 0 : i32
    %c0_i32_1 = arith.constant 0 : i32
    return %c0_i32, %c0_i32_0 : i32, i32
  }
  func.func @transform_7(%arg0: i32) -> (i32, i32) {
    %c0_i32 = arith.constant 0 : i32
    %c0_i32_0 = arith.constant 0 : i32
    return %arg0, %c0_i32 : i32, i32
  }
  func.func @transform_8(%arg0: i32) -> (i32, i32) {
    %c0_i32 = arith.constant 0 : i32
    %c0_i32_0 = arith.constant 0 : i32
    return %arg0, %c0_i32 : i32, i32
  }
}

</mosaic_0001>

<bundles_post_ra>
// kernel: tpu_custom_call.1
= control target key start
LH: loop header
LB: loop body
LE: loop exit
PB: predicated region body
PF: predicated region fallthrough
CT: control target
= control target key end

     0   :  { %14 = vsyncpa [#allocation3], 0  ;;  %s533_s0 = inlined_call_operand.hbm [shape: f32[8,128], index: 0, kind: input, shape index: {}]   ;;  %s534_s1 = inlined_call_operand.hbm [shape: f32[8,128], index: 1, kind: input, shape index: {}]   ;;  %s535_s2 = inlined_call_operand.hbm [shape: f32[128,128], index: 2, kind: input, shape index: {}]   ;;  %s536_s3 = inlined_call_operand.hbm [shape: f32[128,128], index: 3, kind: input, shape index: {}]   ;;  %s537_s4 = inlined_call_operand.vmem [shape: f32[1,128], index: 4, kind: input, shape index: {}]   ;;  %s538_s5 = inlined_call_operand.hbm [shape: f32[128,128], index: 5, kind: input, shape index: {}]   ;;  %s539_s6 = inlined_call_operand.vmem [shape: f32[1,128], index: 6, kind: input, shape index: {}]   ;;  %s540_s7 = inlined_call_operand.hbm [shape: f32[8,128], index: 7, kind: output, shape index: {0}]   ;;  %s541_s8 = inlined_call_operand.hbm [shape: f32[8,128], index: 8, kind: output, shape index: {1}]  }
   0x1   :  { %15 = vsyncpa [#allocation6], 0 }
   0x2   :  { %16 = vsyncpa [#allocation9], 0 }
   0x3   :  { %17 = vsyncpa [#allocation4], 0  ;;  %s35_s29 = sshll.u32 %s534_s1, 4  ;;  %s36_s29 = int_to_ptr.hbm [resolvable:$true] %s35_s29 }
   0x4   :  { %18 = vsyncpa [#allocation13], 0  ;;  %s452_s30 = smov [#allocation5]   ;;  %s58_s12 = sshll.u32 %s536_s3, 4  ;;  %s59_s12 = int_to_ptr.hbm [resolvable:$true] %s58_s12 }
   0x5   :  { %s37_s9 = sshll.u32 %s452_s30, 4  ;;  %s453_s13 = smov [#allocation8]   ;;  %s38_s9 = int_to_ptr.vmem [resolvable:$true] %s37_s9 }
   0x6   :  { %40 = dma.hbm_to_vmem [thread:$0]  %s36_s29, 128, %s38_s9, [#allocation6]  }
   0x7   :  { %s60_s14 = sshll.u32 %s453_s13, 4  ;;  %s24_s17 = sshll.u32 %s533_s0, 4  ;;  %s61_s14 = int_to_ptr.vmem [resolvable:$true] %s60_s14  ;;  %s25_s17 = int_to_ptr.hbm [resolvable:$true] %s24_s17 }
   0x8   :  { %s454_s1 = smov 128   ;;  %s455_s18 = smov 8  }
   0x9   :  { %66 = dma.hbm_to_vmem [thread:$0]  %s59_s12, 2048, %s61_s14, [#allocation9], %s454_s1, %s454_s1, %s455_s18  }
   0xa   :  { %s45_s21 = sshll.u32 %s535_s2, 4  ;;  %s456_s22 = smov [#allocation2]   ;;  %s46_s21 = int_to_ptr.hbm [resolvable:$true] %s45_s21 }
   0xb   :  { %s26_s23 = sshll.u32 %s456_s22, 4  ;;  %s457_s3 = smov [#allocation7]   ;;  %s27_s23 = int_to_ptr.vmem [resolvable:$true] %s26_s23 }
   0xc   :  { %29 = dma.hbm_to_vmem [thread:$0]  %s25_s17, 128, %s27_s23, [#allocation3]  }
   0xd   :  { %s47_s24 = sshll.u32 %s457_s3, 4  ;;  %s73_s0 = sshll.u32 %s538_s5, 4  ;;  %s48_s24 = int_to_ptr.vmem [resolvable:$true] %s47_s24  ;;  %s74_s0 = int_to_ptr.hbm [resolvable:$true] %s73_s0 }
   0xe   :  { %53 = dma.hbm_to_vmem [thread:$0]  %s46_s21, 2048, %s48_s24, [#allocation6], %s454_s1, %s454_s1, %s455_s18  }
   0xf   :  { %s458_s27 = smov [#allocation10]  }
  0x10   :  { %s75_s28 = sshll.u32 %s458_s27, 4  ;;  %s76_s28 = int_to_ptr.vmem [resolvable:$true] %s75_s28 }
  0x11   :  { %81 = dma.hbm_to_vmem [thread:$0]  %s74_s0, 2048, %s76_s28, [#allocation9], %s454_s1, %s454_s1, %s455_s18  }
  0x12   :  { %442 = dma.done.wait [#allocation3], 128  }
  0x13   :  { %443 = vsyncadd [#allocation3], 4294967168 }
  0x14   :  { %444 = dma.done.wait [#allocation6], 2176  }
  0x15   :  { %445 = vsyncadd [#allocation6], 4294965120 }
  0x16   :  { %446 = dma.done.wait [#allocation9], 4096  }
  0x17   :  { %447 = vsyncadd [#allocation9], 4294963200  ;;  %v137_v0 = vld [vmem:[#allocation8 + $0x78] sm:$0xff]  ;;  %v136_v2 = vld [vmem:[#allocation8 + $0x70] sm:$0xff]  ;;  %s459_s29 = smov [#allocation11]   ;;  %s233_s11 = sshll.u32 %s540_s7, 4  ;;  %s234_s11 = int_to_ptr.hbm [resolvable:$true] %s233_s11 }
  0x18   :  { %v120_v1 = vld [vmem:[#allocation7 + $0x78] sm:$0xff]  ;;  %138 = vmatpush.msra.mxu0 %v137_v0  ;;  %v119_v3 = vld [vmem:[#allocation7 + $0x70] sm:$0xff]  ;;  %v135_v4 = vld [vmem:[#allocation8 + $0x68] sm:$0xff]  ;;  %s231_s30 = sshll.u32 %s459_s29, 4  ;;  %s244_s17 = sshll.u32 %s541_s8, 4  ;;  %s232_s30 = int_to_ptr.vmem [resolvable:$true] %s231_s30  ;;  %s245_s17 = int_to_ptr.hbm [resolvable:$true] %s244_s17 }
  0x19   :  { %158 = vmatpush.msra.mxu1 %v120_v1  ;;  %v118_v5 = vld [vmem:[#allocation7 + $0x68] sm:$0xff]  ;;  %v134_v6 = vld [vmem:[#allocation8 + $0x60] sm:$0xff]  ;;  %v133_v8 = vld [vmem:[#allocation8 + $0x58] sm:$0xff] }
  0x1a   :  { %139 = vmatpush.msra.mxu0 %v136_v2  ;;  %v117_v7 = vld [vmem:[#allocation7 + $0x60] sm:$0xff]  ;;  %v116_v9 = vld [vmem:[#allocation7 + $0x58] sm:$0xff]  ;;  %v132_v10 = vld [vmem:[#allocation8 + $0x50] sm:$0xff] }
  0x1b   :  { %159 = vmatpush.msra.mxu1 %v119_v3  ;;  %v115_v11 = vld [vmem:[#allocation7 + $0x50] sm:$0xff]  ;;  %v131_v12 = vld [vmem:[#allocation8 + $0x48] sm:$0xff]  ;;  %v199_v14 = vld [vmem:[#allocation10 + $0x78] sm:$0xff] }
  0x1c   :  { %140 = vmatpush.msra.mxu0 %v135_v4  ;;  %v114_v13 = vld [vmem:[#allocation7 + $0x48] sm:$0xff]  ;;  %v198_v15 = vld [vmem:[#allocation10 + $0x70] sm:$0xff]  ;;  %v130_v16 = vld [vmem:[#allocation8 + $0x40] sm:$0xff]  ;;  %204 = vmatpush.msra.mxu2 %v199_v14 }
  0x1d   :  { %160 = vmatpush.msra.mxu1 %v118_v5  ;;  %v113_v17 = vld [vmem:[#allocation7 + $0x40] sm:$0xff]  ;;  %v197_v18 = vld [vmem:[#allocation10 + $0x68] sm:$0xff]  ;;  %v129_v19 = vld [vmem:[#allocation8 + $0x38] sm:$0xff] }
  0x1e   :  { %141 = vmatpush.msra.mxu0 %v134_v6  ;;  %v112_v20 = vld [vmem:[#allocation7 + $0x38] sm:$0xff]  ;;  %205 = vmatpush.msra.mxu2 %v198_v15  ;;  %v196_v21 = vld [vmem:[#allocation10 + $0x60] sm:$0xff]  ;;  %v128_v22 = vld [vmem:[#allocation8 + $0x30] sm:$0xff] }
  0x1f   :  { %161 = vmatpush.msra.mxu1 %v117_v7  ;;  %v111_v23 = vld [vmem:[#allocation7 + $0x30] sm:$0xff]  ;;  %v195_v24 = vld [vmem:[#allocation10 + $0x58] sm:$0xff]  ;;  %v127_v25 = vld [vmem:[#allocation8 + $0x28] sm:$0xff] }
  0x20   :  { %142 = vmatpush.msra.mxu0 %v133_v8  ;;  %206 = vmatpush.msra.mxu2 %v197_v18  ;;  %v110_v26 = vld [vmem:[#allocation7 + $0x28] sm:$0xff]  ;;  %v194_v27 = vld [vmem:[#allocation10 + $0x50] sm:$0xff]  ;;  %v126_v28 = vld [vmem:[#allocation8 + $0x20] sm:$0xff] }
  0x21   :  { %162 = vmatpush.msra.mxu1 %v116_v9  ;;  %v109_v29 = vld [vmem:[#allocation7 + $0x20] sm:$0xff]  ;;  %v193_v30 = vld [vmem:[#allocation10 + $0x48] sm:$0xff]  ;;  %v125_v31 = vld [vmem:[#allocation8 + $0x18] sm:$0xff] }
  0x22   :  { %143 = vmatpush.msra.mxu0 %v132_v10  ;;  %207 = vmatpush.msra.mxu2 %v196_v21  ;;  %v108_v32 = vld [vmem:[#allocation7 + $0x18] sm:$0xff]  ;;  %v192_v33 = vld [vmem:[#allocation10 + $0x40] sm:$0xff]  ;;  %v124_v34 = vld [vmem:[#allocation8 + $0x10] sm:$0xff] }
  0x23   :  { %163 = vmatpush.msra.mxu1 %v115_v11  ;;  %v107_v35 = vld [vmem:[#allocation7 + $0x10] sm:$0xff]  ;;  %v191_v36 = vld [vmem:[#allocation10 + $0x38] sm:$0xff]  ;;  %v123_v37 = vld [vmem:[#allocation8 + $0x8] sm:$0xff] }
  0x24   :  { %144 = vmatpush.msra.mxu0 %v131_v12  ;;  %208 = vmatpush.msra.mxu2 %v195_v24  ;;  %v106_v38 = vld [vmem:[#allocation7 + $0x8] sm:$0xff]  ;;  %v190_v39 = vld [vmem:[#allocation10 + $0x30] sm:$0xff]  ;;  %v122_v40 = vld [vmem:[#allocation8] sm:$0xff] }
  0x25   :  { %164 = vmatpush.msra.mxu1 %v114_v13  ;;  %v105_v41 = vld [vmem:[#allocation7] sm:$0xff]  ;;  %v121_v42 = vld [vmem:[#allocation5] sm:$0xff]  ;;  %v104_v43 = vld [vmem:[#allocation2] sm:$0xff] }
  0x26   :  { %145 = vmatpush.msra.mxu0 %v130_v16  ;;  %209 = vmatpush.msra.mxu2 %v194_v27  ;;  %v189_v44 = vld [vmem:[#allocation10 + $0x28] sm:$0xff]  ;;  %v188_v45 = vld [vmem:[#allocation10 + $0x20] sm:$0xff]  ;;  %v187_v46 = vld [vmem:[#allocation10 + $0x18] sm:$0xff] }
  0x27   :  { %165 = vmatpush.msra.mxu1 %v113_v17  ;;  %v186_v47 = vld [vmem:[#allocation10 + $0x10] sm:$0xff]  ;;  %v185_v48 = vld [vmem:[#allocation10 + $0x8] sm:$0xff]  ;;  %v184_v49 = vld [vmem:[#allocation10] sm:$0xff] }
  0x28   :  { %146 = vmatpush.msra.mxu0 %v129_v19  ;;  %210 = vmatpush.msra.mxu2 %v193_v30  ;;  %v270_v50 = vld [vmem:[%s537_s4] ss:$0 sm:$0xff]  ;;  %s460_s4 = smov [#allocation12]  }
  0x29   :  { %166 = vmatpush.msra.mxu1 %v112_v20  ;;  %v271_v56 = vld [vmem:[%s539_s6] ss:$0 sm:$0xff]  ;;  %s242_s14 = sshll.u32 %s460_s4, 4  ;;  %s243_s14 = int_to_ptr.vmem [resolvable:$true] %s242_s14 }
  0x2a   :  { %147 = vmatpush.msra.mxu0 %v128_v22  ;;  %211 = vmatpush.msra.mxu2 %v192_v33 }
  0x2b   :  { %167 = vmatpush.msra.mxu1 %v111_v23 }
  0x2c   :  { %148 = vmatpush.msra.mxu0 %v127_v25  ;;  %212 = vmatpush.msra.mxu2 %v191_v36 }
  0x2d   :  { %168 = vmatpush.msra.mxu1 %v110_v26 }
  0x2e   :  { %149 = vmatpush.msra.mxu0 %v126_v28  ;;  %213 = vmatpush.msra.mxu2 %v190_v39 }
  0x2f   :  { %169 = vmatpush.msra.mxu1 %v109_v29 }
  0x30   :  { %150 = vmatpush.msra.mxu0 %v125_v31  ;;  %214 = vmatpush.msra.mxu2 %v189_v44 }
  0x31   :  { %170 = vmatpush.msra.mxu1 %v108_v32 }
  0x32   :  { %151 = vmatpush.msra.mxu0 %v124_v34  ;;  %215 = vmatpush.msra.mxu2 %v188_v45 }
  0x33   :  { %171 = vmatpush.msra.mxu1 %v107_v35 }
  0x34   :  { %152 = vmatpush.msra.mxu0 %v123_v37  ;;  %216 = vmatpush.msra.mxu2 %v187_v46 }
  0x35   :  { %172 = vmatpush.msra.mxu1 %v106_v38 }
  0x36   :  { %153 = vmatpush.msra.mxu0 %v122_v40  ;;  %217 = vmatpush.msra.mxu2 %v186_v47 }
  0x37   :  { %173 = vmatpush.msra.mxu1 %v105_v41  ;;  %154 = vmatmul.f32.vlgmr.msra.gmra.mxu0 %v121_v42 }
  0x38   :  { %174 = vmatmul.f32.vlgmr.msra.gmra.mxu1 %v104_v43  ;;  %218 = vmatpush.msra.mxu2 %v185_v48 }
  0x3a   :  { %219 = vmatpush.msra.mxu2 %v184_v49 }
  0xb4   :  { %v155_v51 = vpop.f32.mrf.mxu0 }
  0xb5   :  { %v175_v52 = vpop.f32.mrf.mxu1 }
  0xb6   :  { %v176_v53 = vadd.f32 %v175_v52, %v155_v51 }
  0xb8   :  { %v182_v54 = vadd.f32 %v270_v50, %v176_v53 }
  0xba   :  { %272 = vtanh.f32 %v182_v54 }
  0xc0   :  { %v273_v55 = vpop.eup %272 }
  0xc1   :  { %224 = vst [vmem:[#allocation11] sm:$0xff] %v273_v55  ;;  %220 = vmatmul.f32.vlgmr.msra.gmra.mxu2 %v273_v55 }
  0xc2   :  { %236 = dma.vmem_to_hbm [thread:$0]  %s232_s30, 128, %s234_s11, [#allocation4]  }
 0x144   :  { %v221_v57 = vpop.f32.mrf.mxu2 }
 0x145   :  { %v222_v58 = vadd.f32 %v271_v56, %v221_v57 }
 0x147   :  { %225 = vst [vmem:[#allocation12] sm:$0xff] %v222_v58 }
 0x148   :  { %247 = dma.vmem_to_hbm [thread:$0]  %s243_s14, 128, %s245_s17, [#allocation13]  }
 0x149   :  { %448 = dma.done.wait [#allocation4], 128  }
 0x14a   :  { %449 = vsyncadd [#allocation4], 4294967168 }
 0x14b   :  { %450 = dma.done.wait [#allocation13], 128  }
 0x14c   :  { %451 = vsyncadd [#allocation13], 4294967168 }
 0x14d   :  { %256 = vsyncpa [#allocation3], 1 }
 0x14e   :  { %257 = vsyncpa [#allocation6], 1 }
 0x14f   :  { %258 = vsyncpa [#allocation9], 1 }
 0x150   :  { %259 = vsyncpa [#allocation4], 1 }
 0x151   :  { %260 = vsyncpa [#allocation13], 1 }

</bundles_post_ra>
